<compile_context>
chip_gen: v6e
topology: v6e:2x2x1
jax: 0.10.0
libtpu: 0.0.40
codegen_flags: <defaults>
</compile_context>

<pallas_src>
import functools

import jax
import jax.numpy as jnp
from jax.experimental import pallas as pl
from jax.experimental.pallas import tpu as pltpu

_LANES = 128


def _focal_loss_kernel(pred_ref, gt_ref, out_ref, acc_ref):
    step = pl.program_id(0)

    @pl.when(step == 0)
    def _():
        acc_ref[0] = 0.0  # running pos_loss sum
        acc_ref[1] = 0.0  # running neg_loss sum
        acc_ref[2] = 0.0  # running num_pos

    pred = pred_ref[...]  # (block_rows, 128) f32
    gt = gt_ref[...]      # (block_rows, 128) f32

    pos_inds = (gt == 1.0).astype(jnp.float32)
    neg_inds = (gt < 1.0).astype(jnp.float32)

    one_m_gt = 1.0 - gt
    sq = one_m_gt * one_m_gt
    neg_weights = sq * sq                     # (1 - gt)^4

    one_m_pred = 1.0 - pred
    pos_term = jnp.log(pred) * (one_m_pred * one_m_pred) * pos_inds
    neg_term = jnp.log(one_m_pred) * (pred * pred) * neg_weights * neg_inds

    acc_ref[0] += jnp.sum(pos_term)
    acc_ref[1] += jnp.sum(neg_term)
    acc_ref[2] += jnp.sum(pos_inds)

    @pl.when(step == pl.num_programs(0) - 1)
    def _():
        pos_sum = acc_ref[0]
        neg_sum = acc_ref[1]
        num_pos = acc_ref[2]
        loss_with_pos = -(pos_sum + neg_sum) / jnp.maximum(num_pos, 1.0)
        out_ref[0] = jnp.where(num_pos > 0.0, loss_with_pos, -neg_sum)


@functools.partial(jax.jit, static_argnames=("block_rows",))
def focal_loss(pred, gt, *, block_rows=512):
    """pred, gt: same shape (e.g. (B, C, H, W)); pred in (0,1), gt in [0,1]."""
    assert pred.shape == gt.shape
    pred = pred.astype(jnp.float32).reshape(-1)
    gt = gt.astype(jnp.float32).reshape(-1)
    total = pred.shape[0]

    rows = pl.cdiv(total, _LANES)
    block_rows = min(block_rows, rows)
    padded_rows = pl.cdiv(rows, block_rows) * block_rows
    pad = padded_rows * _LANES - total
    if pad:
        # Padding contributes exactly zero: gt=2.0 -> pos_inds = neg_inds = 0;
        # pred=0.5 keeps both logs finite.
        pred = jnp.concatenate([pred, jnp.full((pad,), 0.5, jnp.float32)])
        gt = jnp.concatenate([gt, jnp.full((pad,), 2.0, jnp.float32)])

    pred2d = pred.reshape(padded_rows, _LANES)
    gt2d = gt.reshape(padded_rows, _LANES)
    grid = (padded_rows // block_rows,)

    out = pl.pallas_call(
        _focal_loss_kernel,
        out_shape=jax.ShapeDtypeStruct((1,), jnp.float32),
        grid=grid,
        in_specs=[
            pl.BlockSpec((block_rows, _LANES), lambda i: (i, 0)),
            pl.BlockSpec((block_rows, _LANES), lambda i: (i, 0)),
        ],
        out_specs=pl.BlockSpec(memory_space=pltpu.MemorySpace.SMEM),
        scratch_shapes=[pltpu.SMEM((3,), jnp.float32)],
        compiler_params=pltpu.CompilerParams(
            dimension_semantics=("arbitrary",)),
    )(pred2d, gt2d)
    return out[0]


def _reference(pred, gt):
    pred = pred.astype(jnp.float32)
    gt = gt.astype(jnp.float32)
    pos_inds = (gt == 1.0).astype(jnp.float32)
    neg_inds = (gt < 1.0).astype(jnp.float32)
    neg_weights = (1.0 - gt) ** 4
    pos_loss = jnp.sum(jnp.log(pred) * (1.0 - pred) ** 2 * pos_inds)
    neg_loss = jnp.sum(jnp.log(1.0 - pred) * pred ** 2 * neg_weights * neg_inds)
    num_pos = jnp.sum(pos_inds)
    return jnp.where(num_pos == 0.0, -neg_loss,
                     -(pos_loss + neg_loss) / jnp.maximum(num_pos, 1.0))


if __name__ == "__main__":
    key = jax.random.PRNGKey(0)
    k_pred, k_gt, k_pos = jax.random.split(key, 3)

    # pred (batch x c x h x w), gt (batch x c x h x w) — small shapes.
    shape = (2, 4, 16, 16)
    pred = jax.random.uniform(k_pred, shape, jnp.float32,
                              minval=1e-4, maxval=1.0 - 1e-4)
    gt = jax.random.uniform(k_gt, shape, jnp.float32, minval=0.0, maxval=0.999)
    # Sprinkle a few exact-1.0 "positive" peaks, CornerNet-heatmap style.
    gt = jnp.where(jax.random.uniform(k_pos, shape) < 0.02, 1.0, gt)

    out = focal_loss(pred, gt)
    out = jax.block_until_ready(out)

    ref = _reference(pred, gt)
    assert jnp.allclose(out, ref, rtol=1e-4, atol=1e-4), (out, ref)

    print("KERNEL_OK")
</pallas_src>

<mosaic_0001>
module attributes {stable_mosaic.version = 11 : i64} {
  func.func @_focal_loss_kernel(%arg0: i32, %arg1: memref<16x128xf32, #tpu.memory_space<vmem>>, %arg2: memref<16x128xf32, #tpu.memory_space<vmem>>, %arg3: memref<1xf32, #tpu.memory_space<smem>>, %arg4: memref<3xf32, #tpu.memory_space<smem>>) attributes {dimension_semantics = [#tpu.dimension_semantics<arbitrary>], iteration_bounds = array<i64: 1>, scalar_prefetch = 0 : i64, scratch_operands = 1 : i64, tpu.core_type = #tpu.core_type<tc>, window_params = [{transform_indices = @transform_0, window_bounds = array<i64: 16, 128>}, {transform_indices = @transform_1, window_bounds = array<i64: 16, 128>}, {transform_indices = @transform_2, window_bounds = array<i64: 1>}]} {
    %c0_i32 = arith.constant 0 : i32
    %0 = arith.cmpi eq, %arg0, %c0_i32 : i32
    %1 = arith.extui %0 : i1 to i32
    %c0_i32_0 = arith.constant 0 : i32
    %2 = arith.cmpi ne, %1, %c0_i32_0 : i32
    scf.if %2 {
      %cst_16 = arith.constant 0.000000e+00 : f32
      %c0_17 = arith.constant 0 : index
      %52 = memref.load %arg4[%c0_17] : memref<3xf32, #tpu.memory_space<smem>>
      memref.store %cst_16, %arg4[%c0_17] : memref<3xf32, #tpu.memory_space<smem>>
      %cst_18 = arith.constant 0.000000e+00 : f32
      %c1_19 = arith.constant 1 : index
      %53 = memref.load %arg4[%c1_19] : memref<3xf32, #tpu.memory_space<smem>>
      memref.store %cst_18, %arg4[%c1_19] : memref<3xf32, #tpu.memory_space<smem>>
      %cst_20 = arith.constant 0.000000e+00 : f32
      %c2_21 = arith.constant 2 : index
      %54 = memref.load %arg4[%c2_21] : memref<3xf32, #tpu.memory_space<smem>>
      memref.store %cst_20, %arg4[%c2_21] : memref<3xf32, #tpu.memory_space<smem>>
    } else {
    }
    %c0 = arith.constant 0 : index
    %c0_1 = arith.constant 0 : index
    %3 = vector.load %arg1[%c0, %c0_1] : memref<16x128xf32, #tpu.memory_space<vmem>>, vector<16x128xf32>
    %c0_2 = arith.constant 0 : index
    %c0_3 = arith.constant 0 : index
    %4 = vector.load %arg2[%c0_2, %c0_3] : memref<16x128xf32, #tpu.memory_space<vmem>>, vector<16x128xf32>
    %cst = arith.constant 1.000000e+00 : f32
    %5 = vector.broadcast %cst : f32 to vector<16x128xf32>
    %6 = arith.cmpf oeq, %4, %5 : vector<16x128xf32>
    %7 = arith.extui %6 : vector<16x128xi1> to vector<16x128xi32>
    %8 = arith.sitofp %7 : vector<16x128xi32> to vector<16x128xf32>
    %cst_4 = arith.constant 1.000000e+00 : f32
    %9 = vector.broadcast %cst_4 : f32 to vector<16x128xf32>
    %10 = arith.cmpf olt, %4, %9 : vector<16x128xf32>
    %11 = arith.extui %10 : vector<16x128xi1> to vector<16x128xi32>
    %12 = arith.sitofp %11 : vector<16x128xi32> to vector<16x128xf32>
    %cst_5 = arith.constant 1.000000e+00 : f32
    %13 = vector.broadcast %cst_5 : f32 to vector<16x128xf32>
    %14 = arith.subf %13, %4 : vector<16x128xf32>
    %15 = arith.mulf %14, %14 : vector<16x128xf32>
    %16 = arith.mulf %15, %15 : vector<16x128xf32>
    %cst_6 = arith.constant 1.000000e+00 : f32
    %17 = vector.broadcast %cst_6 : f32 to vector<16x128xf32>
    %18 = arith.subf %17, %3 : vector<16x128xf32>
    %19 = math.log %3 : vector<16x128xf32>
    %20 = arith.mulf %18, %18 : vector<16x128xf32>
    %21 = arith.mulf %19, %20 : vector<16x128xf32>
    %22 = arith.mulf %21, %8 : vector<16x128xf32>
    %23 = math.log %18 : vector<16x128xf32>
    %24 = arith.mulf %3, %3 : vector<16x128xf32>
    %25 = arith.mulf %23, %24 : vector<16x128xf32>
    %26 = arith.mulf %25, %16 : vector<16x128xf32>
    %27 = arith.mulf %26, %12 : vector<16x128xf32>
    %c0_7 = arith.constant 0 : index
    %28 = memref.load %arg4[%c0_7] : memref<3xf32, #tpu.memory_space<smem>>
    %29 = vector.shape_cast %22 : vector<16x128xf32> to vector<1x16x128xf32>
    %cst_8 = arith.constant dense<0.000000e+00> : vector<1xf32>
    %30 = vector.multi_reduction <add>, %29, %cst_8 [1, 2] : vector<1x16x128xf32> to vector<1xf32>
    %31 = vector.shape_cast %30 : vector<1xf32> to vector<1x1x1xf32>
    %32 = vector.extract %31[0, 0, 0] : f32 from vector<1x1x1xf32>
    %33 = arith.addf %28, %32 : f32
    %c0_9 = arith.constant 0 : index
    %34 = memref.load %arg4[%c0_9] : memref<3xf32, #tpu.memory_space<smem>>
    memref.store %33, %arg4[%c0_9] : memref<3xf32, #tpu.memory_space<smem>>
    %c1 = arith.constant 1 : index
    %35 = memref.load %arg4[%c1] : memref<3xf32, #tpu.memory_space<smem>>
    %36 = vector.shape_cast %27 : vector<16x128xf32> to vector<1x16x128xf32>
    %cst_10 = arith.constant dense<0.000000e+00> : vector<1xf32>
    %37 = vector.multi_reduction <add>, %36, %cst_10 [1, 2] : vector<1x16x128xf32> to vector<1xf32>
    %38 = vector.shape_cast %37 : vector<1xf32> to vector<1x1x1xf32>
    %39 = vector.extract %38[0, 0, 0] : f32 from vector<1x1x1xf32>
    %40 = arith.addf %35, %39 : f32
    %c1_11 = arith.constant 1 : index
    %41 = memref.load %arg4[%c1_11] : memref<3xf32, #tpu.memory_space<smem>>
    memref.store %40, %arg4[%c1_11] : memref<3xf32, #tpu.memory_space<smem>>
    %c2 = arith.constant 2 : index
    %42 = memref.load %arg4[%c2] : memref<3xf32, #tpu.memory_space<smem>>
    %43 = vector.shape_cast %8 : vector<16x128xf32> to vector<1x16x128xf32>
    %cst_12 = arith.constant dense<0.000000e+00> : vector<1xf32>
    %44 = vector.multi_reduction <add>, %43, %cst_12 [1, 2] : vector<1x16x128xf32> to vector<1xf32>
    %45 = vector.shape_cast %44 : vector<1xf32> to vector<1x1x1xf32>
    %46 = vector.extract %45[0, 0, 0] : f32 from vector<1x1x1xf32>
    %47 = arith.addf %42, %46 : f32
    %c2_13 = arith.constant 2 : index
    %48 = memref.load %arg4[%c2_13] : memref<3xf32, #tpu.memory_space<smem>>
    memref.store %47, %arg4[%c2_13] : memref<3xf32, #tpu.memory_space<smem>>
    %c0_i32_14 = arith.constant 0 : i32
    %49 = arith.cmpi eq, %arg0, %c0_i32_14 : i32
    %50 = arith.extui %49 : i1 to i32
    %c0_i32_15 = arith.constant 0 : i32
    %51 = arith.cmpi ne, %50, %c0_i32_15 : i32
    scf.if %51 {
      %c0_16 = arith.constant 0 : index
      %52 = memref.load %arg4[%c0_16] : memref<3xf32, #tpu.memory_space<smem>>
      %c1_17 = arith.constant 1 : index
      %53 = memref.load %arg4[%c1_17] : memref<3xf32, #tpu.memory_space<smem>>
      %c2_18 = arith.constant 2 : index
      %54 = memref.load %arg4[%c2_18] : memref<3xf32, #tpu.memory_space<smem>>
      %55 = arith.addf %52, %53 : f32
      %cst_19 = arith.constant 0.000000e+00 : f32
      %56 = arith.subf %cst_19, %55 : f32
      %cst_20 = arith.constant 1.000000e+00 : f32
      %57 = arith.maximumf %54, %cst_20 : f32
      %58 = arith.divf %56, %57 : f32
      %cst_21 = arith.constant 0.000000e+00 : f32
      %59 = arith.cmpf ogt, %54, %cst_21 : f32
      %cst_22 = arith.constant 0.000000e+00 : f32
      %60 = arith.subf %cst_22, %53 : f32
      %61 = arith.select %59, %58, %60 : f32
      %c0_23 = arith.constant 0 : index
      %62 = memref.load %arg3[%c0_23] : memref<1xf32, #tpu.memory_space<smem>>
      memref.store %61, %arg3[%c0_23] : memref<1xf32, #tpu.memory_space<smem>>
    } else {
    }
    return
  }
  func.func @transform_0(%arg0: i32) -> (i32, i32) {
    %c0_i32 = arith.constant 0 : i32
    %c0_i32_0 = arith.constant 0 : i32
    return %arg0, %c0_i32 : i32, i32
  }
  func.func @transform_1(%arg0: i32) -> (i32, i32) {
    %c0_i32 = arith.constant 0 : i32
    %c0_i32_0 = arith.constant 0 : i32
    return %arg0, %c0_i32 : i32, i32
  }
  func.func @transform_2(%arg0: i32) -> i32 {
    %c0_i32 = arith.constant 0 : i32
    %c0_i32_0 = arith.constant 0 : i32
    return %c0_i32 : i32
  }
}

</mosaic_0001>

<bundles_post_ra>
// kernel: focal_loss.1
= control target key start
LH: loop header
LB: loop body
LE: loop exit
PB: predicated region body
PF: predicated region fallthrough
CT: control target
= control target key end

     0   :  { %v180_v4 = vmov 0.0   ;;  %s213_s0 = inlined_call_operand.vmem [shape: f32[16,128], index: 0, kind: input, shape index: {}]   ;;  %s214_s1 = inlined_call_operand.vmem [shape: f32[16,128], index: 1, kind: input, shape index: {}]   ;;  %s215_s2 = inlined_call_operand.hbm [shape: f32[1], index: 2, kind: output, shape index: {}]  }
   0x1   :  { %v24_v0 = vld [vmem:[%s214_s1] sm:$0xff]  ;;  %v25_v1 = vld [vmem:[%s214_s1 + $0x8] sm:$0xff] }
   0x2   :  { %v22_v2 = vld [vmem:[%s213_s0] sm:$0xff]  ;;  %vm26_vm0 = vcmp.eq.f32.partialorder %v24_v0, 1.0  ;;  %vm27_vm1 = vcmp.eq.f32.partialorder %v25_v1, 1.0  ;;  %v23_v3 = vld [vmem:[%s213_s0 + $0x8] sm:$0xff] }
   0x3   :  { %v141_v5 = vsel %vm26_vm0, 1.0, %v180_v4  ;;  %v142_v6 = vsel %vm27_vm1, 1.0, %v180_v4  ;;  %v44_v7 = vsub.f32 1.0, %v22_v2  ;;  %v45_v8 = vsub.f32 1.0, %v23_v3 }
   0x4   :  { %7 = vsyncpa [#allocation4], 0  ;;  %v97_v9 = vadd.f32 %v142_v6, %v141_v5  ;;  %160 = vlog2.f32 %v22_v2  ;;  %v38_v10 = vsub.f32 1.0, %v24_v0  ;;  %v39_v11 = vsub.f32 1.0, %v25_v1  ;;  %s181_s18 = smov 1.0   ;;  %s182_s25 = smov [#allocation3]  }
   0x5   :  { %162 = vlog2.f32 %v23_v3  ;;  %v50_v13 = vmul.f32 %v44_v7, %v44_v7  ;;  %v51_v16 = vmul.f32 %v45_v8, %v45_v8  ;;  %v60_v19 = vmul.f32 %v22_v2, %v22_v2 }
   0x6   :  { %98 = vadd.xlane.f32.xlu1 %v97_v9  ;;  %164 = vlog2.f32 %v44_v7  ;;  %v40_v12 = vmul.f32 %v38_v10, %v38_v10  ;;  %v41_v15 = vmul.f32 %v39_v11, %v39_v11  ;;  %v61_v22 = vmul.f32 %v23_v3, %v23_v3 }
   0x7   :  { %166 = vlog2.f32 %v45_v8  ;;  %vm32_vm2 = vcmp.lt.f32.partialorder %v24_v0, 1.0  ;;  %vm33_vm3 = vcmp.lt.f32.partialorder %v25_v1, 1.0 }
   0x8   :  { %v42_v25 = vmul.f32 %v40_v12, %v40_v12  ;;  %v43_v28 = vmul.f32 %v41_v15, %v41_v15  ;;  %v143_v33 = vsel %vm32_vm2, 1.0, %v180_v4  ;;  %v144_v35 = vsel %vm33_vm3, 1.0, %v180_v4 }
  0x11   :  { %v161_v14 = vpop.eup %160 }
  0x12   :  { %v163_v17 = vpop.eup %162  ;;  %v47_v18 = vmul.f32 0.6931472, %v161_v14 }
  0x13   :  { %v165_v20 = vpop.eup %164  ;;  %v49_v21 = vmul.f32 0.6931472, %v163_v17 }
  0x14   :  { %v167_v23 = vpop.eup %166  ;;  %v52_v24 = vmul.f32 %v50_v13, %v47_v18  ;;  %v57_v26 = vmul.f32 0.6931472, %v165_v20 }
  0x15   :  { %v53_v27 = vmul.f32 %v51_v16, %v49_v21  ;;  %v59_v29 = vmul.f32 0.6931472, %v167_v23 }
  0x16   :  { %v54_v30 = vmul.f32 %v141_v5, %v52_v24  ;;  %v62_v31 = vmul.f32 %v60_v19, %v57_v26 }
  0x17   :  { %v55_v32 = vmul.f32 %v142_v6, %v53_v27  ;;  %v63_v34 = vmul.f32 %v61_v22, %v59_v29 }
  0x18   :  { %v64_v36 = vmul.f32 %v62_v31, %v42_v25 }
  0x19   :  { %v69_v37 = vadd.f32 %v55_v32, %v54_v30  ;;  %v65_v38 = vmul.f32 %v63_v34, %v43_v28 }
  0x1a   :  { %v66_v39 = vmul.f32 %v143_v33, %v64_v36 }
  0x1b   :  { %70 = vadd.xlane.f32.xlu0 %v69_v37  ;;  %v67_v40 = vmul.f32 %v144_v35, %v65_v38 }
  0x1d   :  { %v83_v41 = vadd.f32 %v67_v40, %v66_v39 }
  0x1f   :  { %84 = vadd.xlane.f32.xlu0 %v83_v41 }
  0x8f   :  { %v99_v42 = vpop.xlane.xlu1 %98 }
  0x90   :  { %v100_v43 = vrot.slane %v99_v42, 4 }
  0x92   :  { %v101_v44 = vadd.f32 %v100_v43, %v99_v42 }
  0x94   :  { %v102_v48 = vrot.slane %v101_v44, 2 }
  0x96   :  { %v103_v54 = vadd.f32 %v102_v48, %v101_v44 }
  0x98   :  { %v104_v59 = vrot.slane %v103_v54, 1 }
  0x9a   :  { %v105_v62 = vadd.f32 %v104_v59, %v103_v54 }
  0xa4   :  { %v71_v45 = vpop.xlane.xlu0 %70 }
  0xa5   :  { %v72_v46 = vrot.slane %v71_v45, 4 }
  0xa7   :  { %v73_v47 = vadd.f32 %v72_v46, %v71_v45 }
  0xa8   :  { %v85_v49 = vpop.xlane.xlu0 %84 }
  0xa9   :  { %v74_v50 = vrot.slane %v73_v47, 2  ;;  %v86_v51 = vrot.slane %v85_v49, 4 }
  0xab   :  { %v87_v52 = vadd.f32 %v86_v51, %v85_v49  ;;  %v75_v53 = vadd.f32 %v74_v50, %v73_v47 }
  0xad   :  { %v88_v55 = vrot.slane %v87_v52, 2  ;;  %v76_v56 = vrot.slane %v75_v53, 1 }
  0xaf   :  { %v89_v57 = vadd.f32 %v88_v55, %v87_v52  ;;  %v77_v58 = vadd.f32 %v76_v56, %v75_v53 }
  0xb1   :  { %149 = vpush %v77_v58  ;;  %v90_v60 = vrot.slane %v89_v57, 1 }
  0xb3   :  { %v91_v61 = vadd.f32 %v90_v60, %v89_v57 }
  0xb5   :  { %151 = vpush %v91_v61 }
  0xb6   :  { %153 = vpush %v105_v62 }
  0xe2   :  { %s150_s0 = spop %149 }
  0xe6   :  { %s152_s1 = spop %151 }
  0xe7   :  { %s154_s17 = spop %153  ;;  %s116_s20 = sadd.f32 %s152_s1, %s150_s0 }
  0xe8   :  { %s118_s19 = smax.f32 %s181_s18, %s154_s17  ;;  %s124_s22 = ssub.f32 0.0, %s152_s1 }
  0xe9   :  { %v119_v63 = vstv %s118_s19  ;;  %s117_s21 = ssub.f32 0.0, %s116_s20  ;;  %p123_p0 = scmp.gt.f32.partialorder %s154_s17, 0.0 }
  0xea   :  { %168 = vrcp.f32 %v119_v63 }
  0xf7   :  { %v169_v0 = vpop.eup %168 }
  0xf8   :  { %155 = vpush %v169_v0 }
 0x129   :  { %s156_s23 = spop %155 }
 0x12a   :  { %s122_s24 = smul.f32 %s156_s23, %s117_s21 }
 0x12c   :  { %s217_s24 = smov (!%p123_p0, %s122_s24), %s124_s22 }
 0x12d   :  { %127 = sst [smem:[#allocation3]] %s217_s24 }
 0x12e   :  { %135 = dma.smem_to_hbm %s182_s25, 16, %s215_s2, [#allocation4]  }
 0x12f   :  { %178 = dma.done.wait [#allocation4], 16  }
 0x130   :  { %179 = vsyncadd [#allocation4], 4294967280 }
 0x131   :  { %139 = sfence }
 0x132   :  { %140 = vsyncpa [#allocation4], 1 }

</bundles_post_ra>
